<compile_context>
chip_gen: v5e
topology: v5e:2x2
jax: 0.10.0
libtpu: 0.0.40
codegen_flags: <defaults>
</compile_context>

<pallas_src>
import functools

import jax
import jax.numpy as jnp
from jax.experimental import pallas as pl
from jax.experimental.pallas import tpu as pltpu

_VALID_MODES = ("mse", "l1", "charbonnier", "gradient", "tv")
_POINTWISE_MODES = ("mse", "l1", "charbonnier")
_SPATIAL_MODES = ("gradient", "tv")

_LANE = 128
_SUBLANE = 8
_MAX_BLOCK_BYTES = 8 * 1024 * 1024      # absolute cap per input per block


def _round_up(x, m):
    return (x + m - 1) // m * m


def _cdiv(a, b):
    return -(-a // b)


def _vmem_limit_bytes():
    """Generation-aware scoped-VMEM limit: half of physical, capped at 64 MiB
    (v5e/v6e: 64 of 128 MiB; v7x: 32 of 64 MiB; conservative 32 MiB fallback)."""
    cap = 64 * 1024 * 1024
    try:
        got = int(getattr(pltpu.get_tpu_info(), "vmem_capacity_bytes", 0))
        if got >= 32 * 1024 * 1024:
            cap = got
    except Exception:
        pass
    return int(min(cap // 2, 64 * 1024 * 1024))


def _pick_block_rows(n_rows, row_bytes, row_multiple, target_bytes):
    """Largest aligned leading-dim block that fits `target_bytes`, while keeping
    >= 2 grid steps (v7x dual-TensorCore split) and nudging toward an even step
    count.  No divisibility requirement: the tail block is masked in-kernel."""
    tb = (target_bytes // max(row_bytes, 1)) // row_multiple * row_multiple
    tb = max(tb, row_multiple)
    if tb >= n_rows:
        if n_rows > row_multiple:           # whole array fits -> split in two
            tb = _round_up(_cdiv(n_rows, 2), row_multiple)
        else:
            tb = n_rows
    else:
        nb = _cdiv(n_rows, tb)
        if nb > 1 and nb % 2 == 1:          # prefer an even number of blocks
            alt = _round_up(_cdiv(n_rows, nb + 1), row_multiple)
            if row_multiple <= alt < n_rows and _cdiv(n_rows, alt) % 2 == 0:
                tb = alt
    return tb


def _make_kernel(modes, alpha, beta, gamma, epsilon, n_el, n_dx, n_dy,
                 layout, H, W, block_rows, valid_rows):
    """layout: 'flat'   -> (tb, 128) lane-dense rows (pointwise-only modes)
               'folded' -> (tb, H*W//128, 128), one full plane per leading row
               'planes' -> (tb, H, W) full spatial planes (fallback)
       valid_rows: total valid leading rows, or None when every block is full."""
    has_pw = any(m in _POINTWISE_MODES for m in modes)
    do_grad = "gradient" in modes
    do_tv = "tv" in modes
    needs_true = has_pw or do_grad
    w_pt = float(beta) / float(n_el)
    eps2 = float(epsilon) * float(epsilon)

    def body(pred_ref, true_ref, out_ref):
        p = pred_ref[...].astype(jnp.float32)
        d = None
        if needs_true:
            d = p - true_ref[...].astype(jnp.float32)

        # Tail mask (only materialized when the leading dim does not divide).
        if valid_rows is None:
            row_valid = None
        else:
            base = pl.program_id(0) * block_rows
            ids = jax.lax.broadcasted_iota(jnp.int32, p.shape, 0)
            row_valid = (base + ids) < valid_rows

        def msum(x, extra_mask=None):
            m = None
            if row_valid is not None:
                m = row_valid[tuple(slice(0, s) for s in x.shape)]
            if extra_mask is not None:
                m = extra_mask if m is None else jnp.logical_and(m, extra_mask)
            return jnp.sum(x) if m is None else jnp.sum(jnp.where(m, x, 0.0))

        contrib = jnp.float32(0.0)

        if has_pw:
            # All pointwise modes share the same scalar weight beta/n_el, so the
            # elementwise accumulator stays unweighted; the weight is applied once
            # to the reduced scalar (no per-element vmul).
            acc = None
            if "mse" in modes:
                acc = d * d if acc is None else acc + d * d
            if "l1" in modes:
                a = jnp.abs(d)
                acc = a if acc is None else acc + a
            if "charbonnier" in modes:
                c = jnp.sqrt(d * d + jnp.float32(eps2))
                acc = c if acc is None else acc + c
            contrib = contrib + jnp.float32(w_pt) * msum(acc)

        if do_grad or do_tv:
            fold_cmask = None
            if layout == "folded" and 1 < W < _LANE:
                lane = jax.lax.broadcasted_iota(jnp.int32, p.shape, 2)
                fold_cmask = ((lane % W) != (W - 1))[:, :, :-1]

            def dx_dy_sums(x):
                """Unweighted sum|dx|, sum|dy| of forward diffs over full planes.
                Degenerate H==1 / W==1 axes are skipped."""
                sdx = jnp.float32(0.0)
                sdy = jnp.float32(0.0)
                if layout == "folded":
                    # x: (tb, P, 128); lane l of folded row q is flat index
                    # q*128 + l of its plane; W | 128 so column == lane % W.
                    if W > 1:
                        diff = jnp.abs(x[:, :, 1:] - x[:, :, :-1])
                        sdx = msum(diff, fold_cmask)
                    if H > 1:
                        if W < _LANE:
                            sdy = sdy + msum(jnp.abs(x[:, :, W:] - x[:, :, :-W]))
                        if x.shape[1] > 1:
                            sdy = sdy + msum(
                                jnp.abs(x[:, 1:, :W] - x[:, :-1, _LANE - W:]))
                else:
                    # x: (tb, H, W) full planes — diffs never cross blocks.
                    if W > 1:
                        sdx = msum(jnp.abs(x[:, :, 1:] - x[:, :, :-1]))
                    if H > 1:
                        sdy = msum(jnp.abs(x[:, 1:, :] - x[:, :-1, :]))
                return sdx, sdy

            if do_grad:   # |dx(p)-dx(t)| == |dx(p-t)|: differentiate d once.
                gdx, gdy = dx_dy_sums(d)
                if n_dx > 0:
                    contrib = contrib + jnp.float32(alpha / n_dx) * gdx
                if n_dy > 0:
                    contrib = contrib + jnp.float32(alpha / n_dy) * gdy
            if do_tv:
                tdx, tdy = dx_dy_sums(p)
                if n_dx > 0:
                    contrib = contrib + jnp.float32(gamma / n_dx) * tdx
                if n_dy > 0:
                    contrib = contrib + jnp.float32(gamma / n_dy) * tdy

        # Distinct per-step output block -> race-free under a "parallel" grid.
        out_ref[...] = jnp.full((1, 1, 1), contrib, jnp.float32)

    if needs_true:
        def kernel(pred_ref, true_ref, out_ref):
            body(pred_ref, true_ref, out_ref)
    else:
        def kernel(pred_ref, out_ref):      # tv-only: noise_true never DMA'd
            body(pred_ref, None, out_ref)
    return kernel, needs_true


@functools.partial(jax.jit, static_argnames=("mode", "alpha", "beta", "gamma",
                                              "delta", "epsilon", "block_rows"))
def flexible_diffusion_loss(noise_pred, noise_true, *, mode="mse", alpha=0.5,
                            beta=1.0, gamma=0.1, delta=0.1, epsilon=1e-3,
                            block_rows=None):
    del delta  # unused in the PyTorch forward as well
    modes = tuple(mode.split("+"))
    for m in modes:
        if m not in _VALID_MODES:
            raise NotImplementedError(f"Unknown loss type: {m}")
    if noise_pred.ndim != 4 or noise_pred.shape != noise_true.shape:
        raise ValueError("expected matching NCHW inputs")

    N, C, H, W = noise_pred.shape
    NC = N * C
    n_el = NC * H * W
    n_dx = NC * H * (W - 1)
    n_dy = NC * (H - 1) * W

    itemsize = jnp.dtype(noise_pred.dtype).itemsize
    sub_mult = _SUBLANE * max(1, 4 // itemsize)     # 8 for f32, 16 for bf16
    spatial = any(m in _SPATIAL_MODES for m in modes)

    vmem_limit = _vmem_limit_bytes()
    target_bytes = min(_MAX_BLOCK_BYTES, vmem_limit // 6)  # 2 in x 2 bufs + slack

    # Keep native dtype into the kernel (f32 upcast on the VMEM tile).
    if not spatial and n_el % _LANE == 0:
        layout = "flat"
        rows = n_el // _LANE
        p2 = noise_pred.reshape(rows, _LANE)
        t2 = noise_true.reshape(rows, _LANE)
        row_bytes = _LANE * itemsize
        row_multiple = sub_mult
    elif spatial and W <= _LANE and _LANE % W == 0 and (H * W) % _LANE == 0:
        # Lane-folded spatial layout: each HxW plane packed into (P, 128).
        layout = "folded"
        P = (H * W) // _LANE
        rows = NC
        p2 = noise_pred.reshape(NC, P, _LANE)
        t2 = noise_true.reshape(NC, P, _LANE)
        row_bytes = _round_up(P, sub_mult) * _LANE * itemsize
        row_multiple = 1
    else:
        layout = "planes"
        rows = NC
        p2 = noise_pred.reshape(NC, H, W)
        t2 = noise_true.reshape(NC, H, W)
        row_bytes = _round_up(H, sub_mult) * _round_up(W, _LANE) * itemsize
        row_multiple = 1

    if block_rows is not None:
        tb = int(block_rows)
        if tb < 1 or tb > rows:
            raise ValueError("block_rows out of range")
        if layout == "flat" and tb != rows and tb % sub_mult:
            raise ValueError("block_rows must be sublane-aligned or equal the "
                             "row count for the flat layout")
    else:
        tb = _pick_block_rows(rows, row_bytes, row_multiple, target_bytes)

    num_blocks = _cdiv(rows, tb)
    valid_rows = rows if rows % tb else None     # tail block masked in-kernel

    kernel, needs_true = _make_kernel(modes, alpha, beta, gamma, epsilon,
                                      n_el, n_dx, n_dy, layout, H, W, tb,
                                      valid_rows)

    if layout == "flat":
        in_block = pl.BlockSpec((tb, _LANE), lambda i: (i, 0))
    else:
        shp = p2.shape
        in_block = pl.BlockSpec((tb, shp[1], shp[2]), lambda i: (i, 0, 0))

    operands = (p2, t2) if needs_true else (p2,)
    in_specs = [in_block] * len(operands)

    flops = n_el * (4 * len(modes) + (8 if spatial else 0))
    transcendentals = n_el if "charbonnier" in modes else 0
    bytes_accessed = len(operands) * n_el * itemsize + num_blocks * 4

    partials = pl.pallas_call(
        kernel,
        out_shape=jax.ShapeDtypeStruct((num_blocks, 1, 1), jnp.float32),
        grid=(num_blocks,),
        in_specs=in_specs,
        out_specs=pl.BlockSpec((1, 1, 1), lambda i: (i, 0, 0)),
        compiler_params=pltpu.CompilerParams(
            dimension_semantics=("parallel",),
            vmem_limit_bytes=vmem_limit),
        cost_estimate=pl.CostEstimate(flops=flops,
                                      transcendentals=transcendentals,
                                      bytes_accessed=bytes_accessed),
    )(*operands)
    return jnp.sum(partials)


def _reference_loss(pred, true, mode, alpha, beta, gamma, epsilon):
    """Pure-JAX reference matching the PyTorch semantics."""
    pred = pred.astype(jnp.float32)
    true = true.astype(jnp.float32)
    loss = 0.0
    for m in mode.split("+"):
        if m == "mse":
            loss += beta * jnp.mean((pred - true) ** 2)
        elif m == "l1":
            loss += beta * jnp.mean(jnp.abs(pred - true))
        elif m == "charbonnier":
            loss += beta * jnp.mean(jnp.sqrt((pred - true) ** 2 + epsilon ** 2))
        elif m == "gradient":
            pdx = pred[:, :, :, 1:] - pred[:, :, :, :-1]
            tdx = true[:, :, :, 1:] - true[:, :, :, :-1]
            pdy = pred[:, :, 1:, :] - pred[:, :, :-1, :]
            tdy = true[:, :, 1:, :] - true[:, :, :-1, :]
            loss += alpha * (jnp.mean(jnp.abs(pdx - tdx))
                             + jnp.mean(jnp.abs(pdy - tdy)))
        elif m == "tv":
            pdx = pred[:, :, :, 1:] - pred[:, :, :, :-1]
            pdy = pred[:, :, 1:, :] - pred[:, :, :-1, :]
            loss += gamma * (jnp.mean(jnp.abs(pdx)) + jnp.mean(jnp.abs(pdy)))
    return loss


if __name__ == "__main__":
    cases = [
        ((2, 4, 16, 16), "mse", jnp.float32),
        ((2, 4, 16, 16), "l1", jnp.float32),
        ((2, 4, 16, 16), "charbonnier", jnp.float32),
        ((2, 4, 16, 16), "mse+l1", jnp.float32),
        ((2, 4, 16, 16), "gradient", jnp.float32),
        ((2, 4, 16, 16), "tv", jnp.float32),
        ((2, 4, 16, 16), "charbonnier+gradient+tv", jnp.float32),
        ((2, 4, 16, 16), "mse+charbonnier+gradient+tv", jnp.bfloat16),
        ((3, 5, 16, 16), "mse+l1", jnp.float32),        # tail mask (flat layout)
        ((3, 5, 16, 16), "gradient+tv", jnp.float32),   # tail mask (folded layout)
        ((2, 4, 16, 12), "gradient", jnp.float32),      # unfolded fallback (W ∤ 128)
    ]

    ok = True
    for shape, mode, dtype in cases:
        k1, k2 = jax.random.split(jax.random.PRNGKey(0))
        pred = jax.random.normal(k1, shape, dtype=jnp.float32).astype(dtype)
        true = jax.random.normal(k2, shape, dtype=jnp.float32).astype(dtype)

        got = flexible_diffusion_loss(pred, true, mode=mode, alpha=0.5, beta=1.0,
                                      gamma=0.1, delta=0.1, epsilon=1e-3)
        got = jax.block_until_ready(got)
        want = _reference_loss(pred.astype(jnp.float32), true.astype(jnp.float32),
                               mode, alpha=0.5, beta=1.0, gamma=0.1, epsilon=1e-3)
        want = jax.block_until_ready(want)
        if not jnp.allclose(got, want, rtol=1e-5, atol=1e-6):
            ok = False
            print(f"MISMATCH shape={shape} mode={mode} "
                  f"dtype={jnp.dtype(dtype).name}: kernel={got} ref={want}")

    if ok:
        print("KERNEL_OK")
</pallas_src>

<mosaic_0001>
module attributes {stable_mosaic.version = 11 : i64} {
  func.func @kernel(%arg0: i32, %arg1: memref<8x128xf32, #tpu.memory_space<vmem>>, %arg2: memref<8x128xf32, #tpu.memory_space<vmem>>, %arg3: memref<1x1x1xf32, #tpu.memory_space<vmem>>) attributes {dimension_semantics = [#tpu.dimension_semantics<parallel>], iteration_bounds = array<i64: 2>, scalar_prefetch = 0 : i64, scratch_operands = 0 : i64, tpu.core_type = #tpu.core_type<tc>, window_params = [{transform_indices = @transform_0, window_bounds = array<i64: 8, 128>}, {transform_indices = @transform_1, window_bounds = array<i64: 8, 128>}, {transform_indices = @transform_2, window_bounds = array<i64: 1, 1, 1>}]} {
    %c0 = arith.constant 0 : index
    %c0_0 = arith.constant 0 : index
    %0 = vector.load %arg1[%c0, %c0_0] : memref<8x128xf32, #tpu.memory_space<vmem>>, vector<8x128xf32>
    %c0_1 = arith.constant 0 : index
    %c0_2 = arith.constant 0 : index
    %1 = vector.load %arg2[%c0_1, %c0_2] : memref<8x128xf32, #tpu.memory_space<vmem>>, vector<8x128xf32>
    %2 = arith.subf %0, %1 : vector<8x128xf32>
    %3 = arith.mulf %2, %2 : vector<8x128xf32>
    %4 = vector.shape_cast %3 : vector<8x128xf32> to vector<1x8x128xf32>
    %cst = arith.constant dense<0.000000e+00> : vector<1xf32>
    %5 = vector.multi_reduction <add>, %4, %cst [1, 2] : vector<1x8x128xf32> to vector<1xf32>
    %6 = vector.shape_cast %5 : vector<1xf32> to vector<1x1x1xf32>
    %7 = vector.extract %6[0, 0, 0] : f32 from vector<1x1x1xf32>
    %cst_3 = arith.constant 4.8828125E-4 : f32
    %8 = arith.mulf %cst_3, %7 : f32
    %cst_4 = arith.constant 0.000000e+00 : f32
    %9 = arith.addf %cst_4, %8 : f32
    %10 = vector.broadcast %9 : f32 to vector<1x1x1xf32>
    %c0_5 = arith.constant 0 : index
    %c0_6 = arith.constant 0 : index
    %c0_7 = arith.constant 0 : index
    %11 = vector.load %arg3[%c0_5, %c0_6, %c0_7] : memref<1x1x1xf32, #tpu.memory_space<vmem>>, vector<1x1x1xf32>
    tpu.vector_store %arg3[%c0_5, %c0_6, %c0_7], %10 {strides = array<i32>} : memref<1x1x1xf32, #tpu.memory_space<vmem>>, vector<1x1x1xf32>,
    return
  }
  func.func @transform_0(%arg0: i32) -> (i32, i32) {
    %c0_i32 = arith.constant 0 : i32
    %c0_i32_0 = arith.constant 0 : i32
    return %arg0, %c0_i32 : i32, i32
  }
  func.func @transform_1(%arg0: i32) -> (i32, i32) {
    %c0_i32 = arith.constant 0 : i32
    %c0_i32_0 = arith.constant 0 : i32
    return %arg0, %c0_i32 : i32, i32
  }
  func.func @transform_2(%arg0: i32) -> (i32, i32, i32) {
    %c0_i32 = arith.constant 0 : i32
    %c0_i32_0 = arith.constant 0 : i32
    %c0_i32_1 = arith.constant 0 : i32
    return %arg0, %c0_i32, %c0_i32_0 : i32, i32, i32
  }
}

</mosaic_0001>

<bundles_post_ra>
// kernel: flexible_diffusion_loss.1
= control target key start
LH: loop header
LB: loop body
LE: loop exit
PB: predicated region body
PF: predicated region fallthrough
CT: control target
= control target key end

     0   :  { %s273_s9 = smov 0   ;;  %s293_s0 = inlined_call_operand.vmem [shape: f32[16,128], index: 0, kind: input, shape index: {}]   ;;  %s294_s1 = inlined_call_operand.vmem [shape: f32[16,128], index: 1, kind: input, shape index: {}]   ;;  %s295_s2 = inlined_call_operand.vmem [shape: f32[2,1,1], index: 2, kind: output, shape index: {}]  }
   0x1 LB: > { %s231_s10 = sadd.s32 4294967295, %s256_s9   ;;  %p235_p0 = scmp.ge.s32.totalorder %s256_s9, 1  ;;  %s256_s9 = sphi %s273_s9, %s12_s9  }
   0x2   : > { %p120_p1 = scmp.lt.s32.totalorder %s256_s9, 3 }
   0x4   : > { %p121_p2 = pnand %p235_p0, %p120_p1 }
   0x5   : > { %p143_p3 = scmp.lt.s32.totalorder (!%p121_p2), %s231_s10, 1 }
   0x6   : > { %124 = sbr.rel (%p121_p2) target bundleno = 202 (0xca), region = 28 }
   0xb   : > { %s297_s10 = smov (!%p143_p3, %s231_s10), 1  ;;  %vm170_vm0 = vcmask 0  }
   0xc   : > { %s236_s11 = sshll.u32 %s297_s10, 3  ;;  %s153_s21 = scalar_lea.vmem %s295_s2, %s297_s10 }
   0xd   : > { %s146_s14 = scalar_lea.vmem %s293_s0, %s236_s11  ;;  %s150_s17 = scalar_lea.vmem %s294_s1, %s236_s11 }
   0xe   : > { %v154_v0 = vld [vmem:[%s146_s14] sm:$0xff] }
   0xf   : > { %v155_v1 = vld [vmem:[%s150_s17] sm:$0xff] }
  0x10   : > { %v156_v2 = vsub.f32 %v154_v0, %v155_v1 }
  0x12   : > { %v157_v3 = vmul.f32 %v156_v2, %v156_v2 }
  0x14   : > { %158 = vadd.xlane.f32.xlu0 %v157_v3 }
  0x87   : > { %v159_v4 = vpop.xlane.xlu0 %158 }
  0x88   : > { %v160_v5 = vrot.slane %v159_v4, 4 }
  0x8a   : > { %v161_v6 = vadd.f32 %v160_v5, %v159_v4 }
  0x8c   : > { %v162_v7 = vrot.slane %v161_v6, 2 }
  0x8e   : > { %v163_v8 = vadd.f32 %v162_v7, %v161_v6 }
  0x90   : > { %v164_v9 = vrot.slane %v163_v8, 1 }
  0x92   : > { %v165_v10 = vadd.f32 %v164_v9, %v163_v8 }
  0x94   : > { %240 = vpush %v165_v10 }
  0xc5   : > { %s241_s18 = spop %240 }
  0xc6   : > { %s167_s22 = smul.f32 0.00048828125, %s241_s18 }
  0xc8   : > { %v169_v11 = vstv %s167_s22 }
  0xc9   : > { %171 = vst.msk [vmem:[%s153_s21] sm:$0x1] %vm170_vm0, %v169_v11 }
  0xca PF: > { %s12_s9 = sadd.s32 1, %s256_s9  }
  0xcb   : > { %p9_p4 = scmp.ge.s32.totalorder %s12_s9, 4  }
  0xcd   :  { %11 = sbr.rel (!%p9_p4) target bundleno = 1 (0x1), region = 61 }

</bundles_post_ra>
